<compile_context>
chip_gen: v7x
topology: tpu7x:2x2x1
jax: 0.10.0
libtpu: 0.0.40
codegen_flags: <defaults>
</compile_context>

<pallas_src>
import functools

import jax
import jax.numpy as jnp
import numpy as np
from jax import lax
from jax.experimental import pallas as pl
from jax.experimental.pallas import tpu as pltpu

TEMPERATURE = 0.07


# ----------------------------------------------------------------------------
# Tile pickers (tiles must divide B so every score tile lies inside one (view,
# view) repeat of the BxB mask).
# ----------------------------------------------------------------------------
def _pick_divisor(n):
    for t in (256, 128):
        if n % t == 0:
            return t
    # TODO(synk): pad n up to a multiple of 128 and mask padded rows/cols instead
    # of falling back to a whole-axis tile for non-aligned sizes.
    return n


def _pick_row_tile(B, N):
    # Prefer big row tiles (per-step overhead + featc re-read amortization) but
    # keep >= 2 row tiles so both v7x TensorCores get work on the parallel axis.
    for t in (512, 256, 128):
        if B % t == 0 and (N // t) >= 2:
            return t
    for t in (512, 256, 128):
        if B % t == 0:
            return t
    return B


def _pick_col_tile(B):
    return _pick_divisor(B)


# ----------------------------------------------------------------------------
# Kernel C: row-tiled softmax cross-entropy  (F.cross_entropy(logits, labels))
# ----------------------------------------------------------------------------
def _ce_kernel(logits_ref, labels_ref, out_ref):
    logits = logits_ref[...].astype(jnp.float32)     # upcast in-kernel (native-dtype DMA)
    labels = labels_ref[...]                         # (tb, 1) i32
    tb, C = logits.shape
    col = lax.broadcasted_iota(jnp.int32, (tb, C), 1)
    one_hot = col == labels
    row_max = jnp.max(logits, axis=1, keepdims=True)
    lse = jnp.log(jnp.sum(jnp.exp(logits - row_max), axis=1, keepdims=True)) + row_max
    picked = jnp.sum(jnp.where(one_hot, logits, 0.0), axis=1, keepdims=True)
    out_ref[...] = lse - picked                      # per-row CE loss


def cross_entropy_pallas(logits, labels):
    B, C = logits.shape
    tb = _pick_divisor(B)
    labels2d = labels.reshape(B, 1).astype(jnp.int32)
    per_row = pl.pallas_call(
        _ce_kernel,
        grid=(B // tb,),
        in_specs=[
            pl.BlockSpec((tb, C), lambda i: (i, 0)),
            pl.BlockSpec((tb, 1), lambda i: (i, 0)),
        ],
        out_specs=pl.BlockSpec((tb, 1), lambda i: (i, 0)),
        out_shape=jax.ShapeDtypeStruct((B, 1), jnp.float32),
        compiler_params=pltpu.CompilerParams(dimension_semantics=("parallel",)),
    )(logits, labels2d)
    return jnp.mean(per_row)


# ----------------------------------------------------------------------------
# Kernel A: BxB debias mask = (labels == labels.T) * (1 - cosine_similarity(bias))
# (bias rows are pre-normalized in the wrapper; kernel = Gram + compare + select)
# ----------------------------------------------------------------------------
def _mask_kernel(bn_row_ref, bn_all_ref, lab_col_ref, lab_row_ref, out_ref):
    cos = lax.dot_general(bn_row_ref[...], bn_all_ref[...],
                          (((1,), (1,)), ((), ())),
                          preferred_element_type=jnp.float32)   # (tb, B)
    same_label = lab_col_ref[...] == lab_row_ref[...]            # (tb, B)
    out_ref[...] = jnp.where(same_label, 1.0 - cos, 0.0).astype(out_ref.dtype)


# ----------------------------------------------------------------------------
# Kernel B: flash-style DebiasSupConLoss (contrast_mode='all')
# ----------------------------------------------------------------------------
def _supcon_kernel(featr_ref, featc_ref, mask_ref, out_ref,
                   m_sc, l_sc, smask_sc, smadc_sc, *,
                   inv_t, nb_r, nb_c, mask_resident, lane_dense):
    i = pl.program_id(0)
    j = pl.program_id(1)
    tm = featr_ref.shape[0]
    tn = featc_ref.shape[0]
    lane_w = l_sc.shape[1]
    n_groups = tn // lane_w

    @pl.when(j == 0)
    def _():
        m_sc[...] = jnp.full(m_sc.shape, -jnp.inf, jnp.float32)
        l_sc[...] = jnp.zeros(l_sc.shape, jnp.float32)
        smask_sc[...] = jnp.zeros(smask_sc.shape, jnp.float32)
        smadc_sc[...] = jnp.zeros(smadc_sc.shape, jnp.float32)

    # (tm, tn) block of anchor_dot_contrast / T : bf16 MXU inputs, f32 accumulation,
    # 1/T folded as one scalar multiply (no N^2 divide).
    adc = lax.dot_general(featr_ref[...], featc_ref[...],
                          (((1,), (1,)), ((), ())),
                          preferred_element_type=jnp.float32) * inv_t

    # Debias mask block.  Resident path: slice the VMEM-resident BxB mask (DMA'd
    # once); streamed path: per-step bf16 block, upcast on read.
    if mask_resident:
        if nb_r == 1 and nb_c == 1:
            mask_blk = mask_ref[...].astype(jnp.float32)
        else:
            r0 = pl.multiple_of((i % nb_r) * tm, tm)
            c0 = pl.multiple_of((j % nb_c) * tn, tn)
            mask_blk = mask_ref[pl.ds(r0, tm), pl.ds(c0, tn)].astype(jnp.float32)
    else:
        mask_blk = mask_ref[...].astype(jnp.float32)

    # Online row-max over the FULL row (including the self-contrast diagonal),
    # exactly like torch.max(anchor_dot_contrast, dim=1).  This is the only
    # per-step cross-lane (XLU) reduction.
    m_prev = m_sc[...]
    m_new = jnp.maximum(m_prev, jnp.max(adc, axis=1, keepdims=True))
    alpha = jnp.exp(m_prev - m_new)
    m_sc[...] = m_new

    def _fold(x):
        # (tm, tn) -> (tm, lane_w) via elementwise VPU adds of lane groups.
        if n_groups == 1:
            return x
        acc = x[:, 0:lane_w]
        for g in range(1, n_groups):
            acc = acc + x[:, g * lane_w:(g + 1) * lane_w]
        return acc

    def _accumulate(p_blk, msk_blk):
        l_sc[...] = alpha * l_sc[...] + _fold(p_blk)          # exp_logits * logits_mask
        smask_sc[...] = smask_sc[...] + _fold(msk_blk)        # sum(mask)
        smadc_sc[...] = smadc_sc[...] + _fold(msk_blk * adc)  # sum(mask * adc)

    # A block touches the NxN diagonal only if its row/col ranges overlap.
    hits_diag = jnp.logical_and(i * tm < (j + 1) * tn, j * tn < (i + 1) * tm)

    @pl.when(hits_diag)
    def _():
        row_ids = i * tm + lax.broadcasted_iota(jnp.int32, (tm, tn), 0)
        col_ids = j * tn + lax.broadcasted_iota(jnp.int32, (tm, tn), 1)
        not_diag = row_ids != col_ids
        _accumulate(jnp.where(not_diag, jnp.exp(adc - m_new), 0.0),
                    jnp.where(not_diag, mask_blk, 0.0))

    @pl.when(jnp.logical_not(hits_diag))
    def _():
        # Off-diagonal block: no iota / compare / select at all.
        _accumulate(jnp.exp(adc - m_new), mask_blk)

    @pl.when(j == pl.num_programs(1) - 1)
    def _():
        # Single cross-lane reduce of each per-lane accumulator, once per row tile.
        sum_mask = jnp.sum(smask_sc[...], axis=1, keepdims=True)
        smadc_row = jnp.sum(smadc_sc[...], axis=1, keepdims=True)
        l_row = jnp.sum(l_sc[...], axis=1, keepdims=True)
        safe = jnp.where(sum_mask == 0.0, 1.0, sum_mask)      # sum_mask==0 -> 1
        # sum_c mask*log_prob = sum(mask*adc) - sum_mask*(row_max + log(sum_exp + 1e-9))
        log_denom = m_sc[...] + jnp.log(l_row + 1e-9)
        mlpp = (smadc_row - sum_mask * log_denom) / safe      # exact divide (runs once)
        loss_rows = -mlpp                                     # (tm, 1)
        if lane_dense:
            out_ref[...] = loss_rows.reshape(1, tm)           # lane-dense store
        else:
            out_ref[...] = loss_rows


def debias_supcon_pallas(cont_features, cont_labels, cont_bias_feats,
                         temperature=TEMPERATURE, feature_dtype=jnp.bfloat16):
    # cont_features: (B, V, D); cont_labels: (B,); cont_bias_feats: (B, Db)
    # feature_dtype=jnp.float32 gives exact PyTorch-parity MXU inputs if needed.
    B, V, D = cont_features.shape
    Db = cont_bias_feats.shape[1]
    N = B * V

    tm = _pick_row_tile(B, N)          # row tiles (parallel / megacore axis)
    tn = _pick_col_tile(B)             # column / reduction tiles
    nb_r = B // tm
    nb_c = B // tn
    lane_w = 128 if tn % 128 == 0 else tn
    lane_dense = (tm % 128 == 0)

    # Resident BxB mask if it comfortably fits VMEM (<= ~40 MiB incl. double
    # buffering -> B up to ~2k even on v7x's 64 MiB); otherwise stream bf16 blocks.
    mask_resident = (2 * B * B * 4) <= (40 << 20)
    mask_dtype = jnp.float32 if mask_resident else jnp.bfloat16

    # --- Kernel A: BxB mask.  Normalization hoisted out (computed once). ---
    bias = cont_bias_feats.astype(jnp.float32)
    nsq = jnp.sum(bias * bias, axis=1, keepdims=True)
    bias_n = bias * lax.rsqrt(jnp.where(nsq == 0.0, 1.0, nsq))   # zero-norm -> identity
    lab_col = cont_labels.reshape(B, 1).astype(jnp.int32)
    lab_row = cont_labels.reshape(1, B).astype(jnp.int32)
    tma = _pick_divisor(B)
    mask_bb = pl.pallas_call(
        _mask_kernel,
        grid=(B // tma,),
        in_specs=[
            pl.BlockSpec((tma, Db), lambda i: (i, 0)),
            pl.BlockSpec((B, Db), lambda i: (0, 0)),
            pl.BlockSpec((tma, 1), lambda i: (i, 0)),
            pl.BlockSpec((1, B), lambda i: (0, 0)),
        ],
        out_specs=pl.BlockSpec((tma, B), lambda i: (i, 0)),
        out_shape=jax.ShapeDtypeStruct((B, B), mask_dtype),
        compiler_params=pltpu.CompilerParams(dimension_semantics=("parallel",)),
    )(bias_n, bias_n, lab_col, lab_row)

    # --- Kernel B: tiled supcon loss ---
    # torch.cat(torch.unbind(features, 1), 0) -> view-major (V*B, D); one fused
    # transpose+cast (bf16 MXU inputs, f32 accumulation).
    # TODO(synk): if production D < 128, pad D up to 128 (or carry (D, N) layout)
    # so feature blocks fill the 128-lane dimension instead of padded tiles.
    contrast = jnp.swapaxes(cont_features, 0, 1).reshape(N, D).astype(feature_dtype)

    if mask_resident:
        # Constant block index => the BxB mask is DMA'd once and stays VMEM-resident.
        mask_spec = pl.BlockSpec((B, B), lambda i, j: (0, 0))
    else:
        mask_spec = pl.BlockSpec((tm, tn), lambda i, j: (i % nb_r, j % nb_c))

    if lane_dense:
        out_shape = jax.ShapeDtypeStruct((1, N), jnp.float32)
        out_spec = pl.BlockSpec((1, tm), lambda i, j: (0, i))
    else:
        out_shape = jax.ShapeDtypeStruct((N, 1), jnp.float32)
        out_spec = pl.BlockSpec((tm, 1), lambda i, j: (i, 0))

    # VMEM limit computed from the actual working set (not hard-coded).
    def _pad(x, m):
        return ((x + m - 1) // m) * m
    fbytes = jnp.dtype(feature_dtype).itemsize
    need = 2 * _pad(tm, 8) * _pad(D, 128) * fbytes          # featr, double-buffered
    need += 2 * _pad(tn, 8) * _pad(D, 128) * fbytes         # featc, double-buffered
    if mask_resident:
        need += 2 * _pad(B, 8) * _pad(B, 128) * 4           # resident mask (f32)
    else:
        need += 2 * _pad(tm, 8) * _pad(tn, 128) * 2         # streamed bf16 mask blocks
    need += (_pad(tm, 8) * 128 + 3 * _pad(tm, 8) * _pad(lane_w, 128)) * 4   # scratch
    need += 2 * _pad(tm, 8) * 128 * 4                       # output blocks
    vmem_limit = int(min(56 << 20, max(16 << 20, need + (8 << 20))))

    per_row = pl.pallas_call(
        functools.partial(_supcon_kernel, inv_t=float(1.0 / temperature),
                          nb_r=nb_r, nb_c=nb_c,
                          mask_resident=mask_resident, lane_dense=lane_dense),
        grid=(N // tm, N // tn),            # row tiles (parallel) x col tiles (reduction)
        in_specs=[
            pl.BlockSpec((tm, D), lambda i, j: (i, 0)),
            pl.BlockSpec((tn, D), lambda i, j: (j, 0)),
            mask_spec,
        ],
        out_specs=out_spec,
        out_shape=out_shape,
        scratch_shapes=[pltpu.VMEM((tm, 1), jnp.float32),        # running row max
                        pltpu.VMEM((tm, lane_w), jnp.float32),   # per-lane exp-sum
                        pltpu.VMEM((tm, lane_w), jnp.float32),   # per-lane sum(mask)
                        pltpu.VMEM((tm, lane_w), jnp.float32)],  # per-lane sum(mask*adc)
        compiler_params=pltpu.CompilerParams(
            dimension_semantics=("parallel", "arbitrary"),
            vmem_limit_bytes=vmem_limit),
    )(contrast, contrast, mask_bb)

    return jnp.mean(per_row)


# ----------------------------------------------------------------------------
# UnsupBiasContrastiveLoss.forward
# ----------------------------------------------------------------------------
def unsup_bias_contrastive_loss(logits, labels, cont_features, cont_labels,
                                cont_bias_feats, temperature=TEMPERATURE):
    ce_loss = cross_entropy_pallas(logits, labels)
    con_loss = debias_supcon_pallas(cont_features, cont_labels, cont_bias_feats,
                                    temperature)
    return ce_loss, con_loss


# ----------------------------------------------------------------------------
# Pure-JAX f32 reference (mirrors the PyTorch code) for a sanity check.
# ----------------------------------------------------------------------------
def _reference(logits, labels, feats, clabels, bias, T=TEMPERATURE):
    lse = jax.nn.logsumexp(logits, axis=1)
    ce = jnp.mean(lse - logits[jnp.arange(logits.shape[0]), labels])

    nrm = jnp.linalg.norm(bias, axis=1, keepdims=True)
    nrm = jnp.where(nrm == 0, 1.0, nrm)
    bn = bias / nrm
    mask0 = 1.0 - bn @ bn.T

    B, V, D = feats.shape
    N = B * V
    cf = jnp.concatenate([feats[:, v] for v in range(V)], axis=0)
    lab = clabels.reshape(-1, 1)
    mask = (lab == lab.T).astype(jnp.float32) * mask0
    adc = (cf @ cf.T) / T
    lg = adc - jnp.max(adc, axis=1, keepdims=True)
    mask = jnp.tile(mask, (V, V))
    lm = 1.0 - jnp.eye(N, dtype=jnp.float32)
    mask = mask * lm
    exp_l = jnp.exp(lg) * lm
    log_prob = lg - jnp.log(exp_l.sum(1, keepdims=True) + 1e-9)
    sm = mask.sum(1)
    sm = jnp.where(sm == 0, 1.0, sm)
    mlpp = (mask * log_prob).sum(1) / sm
    return ce, jnp.mean(-mlpp)


if __name__ == "__main__":
    key = jax.random.PRNGKey(0)
    B, V, D, C, Db = 8, 2, 32, 4, 16
    k1, k2, k3, k4, k5 = jax.random.split(key, 5)

    logits = jax.random.normal(k1, (B, C), dtype=jnp.float32)
    labels = jax.random.randint(k2, (B,), 0, C, dtype=jnp.int32)
    cont_features = jax.random.normal(k3, (B, V, D), dtype=jnp.float32)
    cont_features = cont_features / jnp.linalg.norm(cont_features, axis=-1,
                                                    keepdims=True)
    cont_labels = jax.random.randint(k4, (B,), 0, 2, dtype=jnp.int32)
    cont_bias_feats = jax.random.normal(k5, (B, Db), dtype=jnp.float32)

    loss_fn = jax.jit(unsup_bias_contrastive_loss)
    ce_loss, con_loss = loss_fn(logits, labels, cont_features, cont_labels,
                                cont_bias_feats)
    jax.block_until_ready((ce_loss, con_loss))

    ce_ref, con_ref = _reference(logits, labels, cont_features, cont_labels,
                                 cont_bias_feats)
    assert np.allclose(np.asarray(ce_loss), np.asarray(ce_ref), rtol=2e-2, atol=2e-2)
    assert np.allclose(np.asarray(con_loss), np.asarray(con_ref), rtol=2e-2, atol=2e-2)
    print("KERNEL_OK")
</pallas_src>

<mosaic_0001>
module attributes {stable_mosaic.version = 11 : i64} {
  func.func @_ce_kernel(%arg0: i32, %arg1: memref<8x4xf32, #tpu.memory_space<vmem>>, %arg2: memref<8x1xi32, #tpu.memory_space<vmem>>, %arg3: memref<8x1xf32, #tpu.memory_space<vmem>>) attributes {dimension_semantics = [#tpu.dimension_semantics<parallel>], iteration_bounds = array<i64: 1>, scalar_prefetch = 0 : i64, scratch_operands = 0 : i64, tpu.core_type = #tpu.core_type<tc>, window_params = [{transform_indices = @transform_0, window_bounds = array<i64: 8, 4>}, {transform_indices = @transform_1, window_bounds = array<i64: 8, 1>}, {transform_indices = @transform_2, window_bounds = array<i64: 8, 1>}]} {
    %c0 = arith.constant 0 : index
    %c0_0 = arith.constant 0 : index
    %0 = vector.load %arg1[%c0, %c0_0] : memref<8x4xf32, #tpu.memory_space<vmem>>, vector<8x4xf32>
    %c0_1 = arith.constant 0 : index
    %c0_2 = arith.constant 0 : index
    %1 = vector.load %arg2[%c0_1, %c0_2] : memref<8x1xi32, #tpu.memory_space<vmem>>, vector<8x1xi32>
    %2 = tpu.iota {dimensions = array<i32: 1>} : vector<8x4xi32>
    %3 = vector.broadcast %1 : vector<8x1xi32> to vector<8x4xi32>
    %4 = arith.cmpi eq, %2, %3 : vector<8x4xi32>
    %cst = arith.constant dense<0xFF800000> : vector<8xf32>
    %5 = vector.multi_reduction <maximumf>, %0, %cst [1] : vector<8x4xf32> to vector<8xf32>
    %6 = vector.shape_cast %5 : vector<8xf32> to vector<8x1xf32>
    %7 = vector.broadcast %6 : vector<8x1xf32> to vector<8x4xf32>
    %8 = arith.subf %0, %7 : vector<8x4xf32>
    %9 = math.exp %8 : vector<8x4xf32>
    %cst_3 = arith.constant dense<0.000000e+00> : vector<8xf32>
    %10 = vector.multi_reduction <add>, %9, %cst_3 [1] : vector<8x4xf32> to vector<8xf32>
    %11 = vector.shape_cast %10 : vector<8xf32> to vector<8x1xf32>
    %12 = math.log %11 : vector<8x1xf32>
    %13 = arith.addf %12, %6 : vector<8x1xf32>
    %cst_4 = arith.constant 0.000000e+00 : f32
    %14 = vector.broadcast %cst_4 : f32 to vector<8x4xf32>
    %15 = arith.select %4, %0, %14 : vector<8x4xi1>, vector<8x4xf32>
    %cst_5 = arith.constant dense<0.000000e+00> : vector<8xf32>
    %16 = vector.multi_reduction <add>, %15, %cst_5 [1] : vector<8x4xf32> to vector<8xf32>
    %17 = vector.shape_cast %16 : vector<8xf32> to vector<8x1xf32>
    %18 = arith.subf %13, %17 : vector<8x1xf32>
    %c0_6 = arith.constant 0 : index
    %c0_7 = arith.constant 0 : index
    %19 = vector.load %arg3[%c0_6, %c0_7] : memref<8x1xf32, #tpu.memory_space<vmem>>, vector<8x1xf32>
    tpu.vector_store %arg3[%c0_6, %c0_7], %18 {strides = array<i32>} : memref<8x1xf32, #tpu.memory_space<vmem>>, vector<8x1xf32>,
    return
  }
  func.func @transform_0(%arg0: i32) -> (i32, i32) {
    %c0_i32 = arith.constant 0 : i32
    %c0_i32_0 = arith.constant 0 : i32
    return %arg0, %c0_i32 : i32, i32
  }
  func.func @transform_1(%arg0: i32) -> (i32, i32) {
    %c0_i32 = arith.constant 0 : i32
    %c0_i32_0 = arith.constant 0 : i32
    return %arg0, %c0_i32 : i32, i32
  }
  func.func @transform_2(%arg0: i32) -> (i32, i32) {
    %c0_i32 = arith.constant 0 : i32
    %c0_i32_0 = arith.constant 0 : i32
    return %arg0, %c0_i32 : i32, i32
  }
}

module attributes {stable_mosaic.version = 11 : i64} {
  func.func @_mask_kernel(%arg0: i32, %arg1: memref<8x16xf32, #tpu.memory_space<vmem>>, %arg2: memref<8x16xf32, #tpu.memory_space<vmem>>, %arg3: memref<8x1xi32, #tpu.memory_space<vmem>>, %arg4: memref<1x8xi32, #tpu.memory_space<vmem>>, %arg5: memref<8x8xf32, #tpu.memory_space<vmem>>) attributes {dimension_semantics = [#tpu.dimension_semantics<parallel>], iteration_bounds = array<i64: 1>, scalar_prefetch = 0 : i64, scratch_operands = 0 : i64, tpu.core_type = #tpu.core_type<tc>, window_params = [{transform_indices = @transform_0, window_bounds = array<i64: 8, 16>}, {pipeline_mode = #tpu.pipeline_mode<synchronous>, transform_indices = @transform_1, window_bounds = array<i64: 8, 16>}, {transform_indices = @transform_2, window_bounds = array<i64: 8, 1>}, {pipeline_mode = #tpu.pipeline_mode<synchronous>, transform_indices = @transform_3, window_bounds = array<i64: 1, 8>}, {transform_indices = @transform_4, window_bounds = array<i64: 8, 8>}]} {
    %c0 = arith.constant 0 : index
    %c0_0 = arith.constant 0 : index
    %0 = vector.load %arg1[%c0, %c0_0] : memref<8x16xf32, #tpu.memory_space<vmem>>, vector<8x16xf32>
    %c0_1 = arith.constant 0 : index
    %c0_2 = arith.constant 0 : index
    %1 = vector.load %arg2[%c0_1, %c0_2] : memref<8x16xf32, #tpu.memory_space<vmem>>, vector<8x16xf32>
    %cst = arith.constant dense<0.000000e+00> : vector<8x8xf32>
    %2 = tpu.matmul %0, %1, %cst {dimension_numbers = #tpu.dot_dimension_numbers<[1], [1], [0], [0], [0, 0, 1, 0], [], []>} : vector<8x16xf32>, vector<8x16xf32>, vector<8x8xf32> -> vector<8x8xf32>
    %c0_3 = arith.constant 0 : index
    %c0_4 = arith.constant 0 : index
    %3 = vector.load %arg3[%c0_3, %c0_4] : memref<8x1xi32, #tpu.memory_space<vmem>>, vector<8x1xi32>
    %c0_5 = arith.constant 0 : index
    %c0_6 = arith.constant 0 : index
    %4 = vector.load %arg4[%c0_5, %c0_6] : memref<1x8xi32, #tpu.memory_space<vmem>>, vector<1x8xi32>
    %5 = vector.broadcast %3 : vector<8x1xi32> to vector<8x8xi32>
    %6 = vector.broadcast %4 : vector<1x8xi32> to vector<8x8xi32>
    %7 = arith.cmpi eq, %5, %6 : vector<8x8xi32>
    %cst_7 = arith.constant 1.000000e+00 : f32
    %8 = vector.broadcast %cst_7 : f32 to vector<8x8xf32>
    %9 = arith.subf %8, %2 : vector<8x8xf32>
    %cst_8 = arith.constant 0.000000e+00 : f32
    %10 = vector.broadcast %cst_8 : f32 to vector<8x8xf32>
    %11 = arith.select %7, %9, %10 : vector<8x8xi1>, vector<8x8xf32>
    %c0_9 = arith.constant 0 : index
    %c0_10 = arith.constant 0 : index
    %12 = vector.load %arg5[%c0_9, %c0_10] : memref<8x8xf32, #tpu.memory_space<vmem>>, vector<8x8xf32>
    tpu.vector_store %arg5[%c0_9, %c0_10], %11 {strides = array<i32>} : memref<8x8xf32, #tpu.memory_space<vmem>>, vector<8x8xf32>,
    return
  }
  func.func @transform_0(%arg0: i32) -> (i32, i32) {
    %c0_i32 = arith.constant 0 : i32
    %c0_i32_0 = arith.constant 0 : i32
    return %arg0, %c0_i32 : i32, i32
  }
  func.func @transform_1(%arg0: i32) -> (i32, i32) {
    %c0_i32 = arith.constant 0 : i32
    %c0_i32_0 = arith.constant 0 : i32
    %c0_i32_1 = arith.constant 0 : i32
    return %c0_i32, %c0_i32_0 : i32, i32
  }
  func.func @transform_2(%arg0: i32) -> (i32, i32) {
    %c0_i32 = arith.constant 0 : i32
    %c0_i32_0 = arith.constant 0 : i32
    return %arg0, %c0_i32 : i32, i32
  }
  func.func @transform_3(%arg0: i32) -> (i32, i32) {
    %c0_i32 = arith.constant 0 : i32
    %c0_i32_0 = arith.constant 0 : i32
    %c0_i32_1 = arith.constant 0 : i32
    return %c0_i32, %c0_i32_0 : i32, i32
  }
  func.func @transform_4(%arg0: i32) -> (i32, i32) {
    %c0_i32 = arith.constant 0 : i32
    %c0_i32_0 = arith.constant 0 : i32
    return %arg0, %c0_i32 : i32, i32
  }
}

module attributes {stable_mosaic.version = 11 : i64} {
  func.func @_supcon_kernel(%arg0: i32, %arg1: i32, %arg2: memref<8x32xbf16, #tpu.memory_space<vmem>>, %arg3: memref<8x32xbf16, #tpu.memory_space<vmem>>, %arg4: memref<8x8xf32, #tpu.memory_space<vmem>>, %arg5: memref<8x1xf32, #tpu.memory_space<vmem>>, %arg6: memref<8x1xf32, #tpu.memory_space<vmem>>, %arg7: memref<8x8xf32, #tpu.memory_space<vmem>>, %arg8: memref<8x8xf32, #tpu.memory_space<vmem>>, %arg9: memref<8x8xf32, #tpu.memory_space<vmem>>) attributes {dimension_semantics = [#tpu.dimension_semantics<parallel>, #tpu.dimension_semantics<arbitrary>], iteration_bounds = array<i64: 2, 2>, scalar_prefetch = 0 : i64, scratch_operands = 4 : i64, tpu.core_type = #tpu.core_type<tc>, window_params = [{transform_indices = @transform_0, window_bounds = array<i64: 8, 32>}, {transform_indices = @transform_1, window_bounds = array<i64: 8, 32>}, {pipeline_mode = #tpu.pipeline_mode<synchronous>, transform_indices = @transform_2, window_bounds = array<i64: 8, 8>}, {transform_indices = @transform_3, window_bounds = array<i64: 8, 1>}]} {
    %c0_i32 = arith.constant 0 : i32
    %0 = arith.cmpi eq, %arg1, %c0_i32 : i32
    %1 = arith.extui %0 : i1 to i32
    %c0_i32_0 = arith.constant 0 : i32
    %2 = arith.cmpi ne, %1, %c0_i32_0 : i32
    scf.if %2 {
      %cst_20 = arith.constant 0xFF800000 : f32
      %33 = vector.broadcast %cst_20 : f32 to vector<8x1xf32>
      %c0_21 = arith.constant 0 : index
      %c0_22 = arith.constant 0 : index
      %34 = vector.load %arg6[%c0_21, %c0_22] : memref<8x1xf32, #tpu.memory_space<vmem>>, vector<8x1xf32>
      tpu.vector_store %arg6[%c0_21, %c0_22], %33 {strides = array<i32>} : memref<8x1xf32, #tpu.memory_space<vmem>>, vector<8x1xf32>,
      %cst_23 = arith.constant 0.000000e+00 : f32
      %35 = vector.broadcast %cst_23 : f32 to vector<8x8xf32>
      %c0_24 = arith.constant 0 : index
      %c0_25 = arith.constant 0 : index
      %36 = vector.load %arg7[%c0_24, %c0_25] : memref<8x8xf32, #tpu.memory_space<vmem>>, vector<8x8xf32>
      tpu.vector_store %arg7[%c0_24, %c0_25], %35 {strides = array<i32>} : memref<8x8xf32, #tpu.memory_space<vmem>>, vector<8x8xf32>,
      %cst_26 = arith.constant 0.000000e+00 : f32
      %37 = vector.broadcast %cst_26 : f32 to vector<8x8xf32>
      %c0_27 = arith.constant 0 : index
      %c0_28 = arith.constant 0 : index
      %38 = vector.load %arg8[%c0_27, %c0_28] : memref<8x8xf32, #tpu.memory_space<vmem>>, vector<8x8xf32>
      tpu.vector_store %arg8[%c0_27, %c0_28], %37 {strides = array<i32>} : memref<8x8xf32, #tpu.memory_space<vmem>>, vector<8x8xf32>,
      %cst_29 = arith.constant 0.000000e+00 : f32
      %39 = vector.broadcast %cst_29 : f32 to vector<8x8xf32>
      %c0_30 = arith.constant 0 : index
      %c0_31 = arith.constant 0 : index
      %40 = vector.load %arg9[%c0_30, %c0_31] : memref<8x8xf32, #tpu.memory_space<vmem>>, vector<8x8xf32>
      tpu.vector_store %arg9[%c0_30, %c0_31], %39 {strides = array<i32>} : memref<8x8xf32, #tpu.memory_space<vmem>>, vector<8x8xf32>,
    } else {
    }
    %c0 = arith.constant 0 : index
    %c0_1 = arith.constant 0 : index
    %3 = vector.load %arg2[%c0, %c0_1] : memref<8x32xbf16, #tpu.memory_space<vmem>>, vector<8x32xbf16>
    %c0_2 = arith.constant 0 : index
    %c0_3 = arith.constant 0 : index
    %4 = vector.load %arg3[%c0_2, %c0_3] : memref<8x32xbf16, #tpu.memory_space<vmem>>, vector<8x32xbf16>
    %cst = arith.constant dense<0.000000e+00> : vector<8x8xf32>
    %5 = tpu.matmul %3, %4, %cst {dimension_numbers = #tpu.dot_dimension_numbers<[1], [1], [0], [0], [0, 0, 1, 0], [], []>} : vector<8x32xbf16>, vector<8x32xbf16>, vector<8x8xf32> -> vector<8x8xf32>
    %cst_4 = arith.constant 14.2857141 : f32
    %6 = vector.broadcast %cst_4 : f32 to vector<8x8xf32>
    %7 = arith.mulf %5, %6 : vector<8x8xf32>
    %c0_5 = arith.constant 0 : index
    %c0_6 = arith.constant 0 : index
    %8 = vector.load %arg4[%c0_5, %c0_6] : memref<8x8xf32, #tpu.memory_space<vmem>>, vector<8x8xf32>
    %c0_7 = arith.constant 0 : index
    %c0_8 = arith.constant 0 : index
    %9 = vector.load %arg6[%c0_7, %c0_8] : memref<8x1xf32, #tpu.memory_space<vmem>>, vector<8x1xf32>
    %cst_9 = arith.constant dense<0xFF800000> : vector<8xf32>
    %10 = vector.multi_reduction <maximumf>, %7, %cst_9 [1] : vector<8x8xf32> to vector<8xf32>
    %11 = vector.shape_cast %10 : vector<8xf32> to vector<8x1xf32>
    %12 = arith.maximumf %9, %11 : vector<8x1xf32>
    %13 = arith.subf %9, %12 : vector<8x1xf32>
    %14 = math.exp %13 : vector<8x1xf32>
    %c0_10 = arith.constant 0 : index
    %c0_11 = arith.constant 0 : index
    %15 = vector.load %arg6[%c0_10, %c0_11] : memref<8x1xf32, #tpu.memory_space<vmem>>, vector<8x1xf32>
    tpu.vector_store %arg6[%c0_10, %c0_11], %12 {strides = array<i32>} : memref<8x1xf32, #tpu.memory_space<vmem>>, vector<8x1xf32>,
    %c8_i32 = arith.constant 8 : i32
    %16 = arith.muli %arg0, %c8_i32 : i32
    %c1_i32 = arith.constant 1 : i32
    %17 = arith.addi %arg1, %c1_i32 : i32
    %c8_i32_12 = arith.constant 8 : i32
    %18 = arith.muli %17, %c8_i32_12 : i32
    %19 = arith.cmpi slt, %16, %18 : i32
    %c8_i32_13 = arith.constant 8 : i32
    %20 = arith.muli %arg1, %c8_i32_13 : i32
    %c1_i32_14 = arith.constant 1 : i32
    %21 = arith.addi %arg0, %c1_i32_14 : i32
    %c8_i32_15 = arith.constant 8 : i32
    %22 = arith.muli %21, %c8_i32_15 : i32
    %23 = arith.cmpi slt, %20, %22 : i32
    %24 = arith.andi %19, %23 : i1
    %25 = arith.extui %24 : i1 to i32
    %c0_i32_16 = arith.constant 0 : i32
    %26 = arith.cmpi ne, %25, %c0_i32_16 : i32
    scf.if %26 {
      %c8_i32_20 = arith.constant 8 : i32
      %33 = arith.muli %arg0, %c8_i32_20 : i32
      %34 = tpu.iota {dimensions = array<i32: 0>} : vector<8x8xi32>
      %35 = vector.broadcast %33 : i32 to vector<8x8xi32>
      %36 = arith.addi %35, %34 : vector<8x8xi32>
      %c8_i32_21 = arith.constant 8 : i32
      %37 = arith.muli %arg1, %c8_i32_21 : i32
      %38 = tpu.iota {dimensions = array<i32: 1>} : vector<8x8xi32>
      %39 = vector.broadcast %37 : i32 to vector<8x8xi32>
      %40 = arith.addi %39, %38 : vector<8x8xi32>
      %41 = arith.cmpi ne, %36, %40 : vector<8x8xi32>
      %42 = vector.broadcast %12 : vector<8x1xf32> to vector<8x8xf32>
      %43 = arith.subf %7, %42 : vector<8x8xf32>
      %44 = math.exp %43 : vector<8x8xf32>
      %cst_22 = arith.constant 0.000000e+00 : f32
      %45 = vector.broadcast %cst_22 : f32 to vector<8x8xf32>
      %46 = arith.select %41, %44, %45 : vector<8x8xi1>, vector<8x8xf32>
      %cst_23 = arith.constant 0.000000e+00 : f32
      %47 = vector.broadcast %cst_23 : f32 to vector<8x8xf32>
      %48 = arith.select %41, %8, %47 : vector<8x8xi1>, vector<8x8xf32>
      %c0_24 = arith.constant 0 : index
      %c0_25 = arith.constant 0 : index
      %49 = vector.load %arg7[%c0_24, %c0_25] : memref<8x8xf32, #tpu.memory_space<vmem>>, vector<8x8xf32>
      %50 = vector.broadcast %14 : vector<8x1xf32> to vector<8x8xf32>
      %51 = arith.mulf %50, %49 : vector<8x8xf32>
      %52 = arith.addf %51, %46 : vector<8x8xf32>
      %c0_26 = arith.constant 0 : index
      %c0_27 = arith.constant 0 : index
      %53 = vector.load %arg7[%c0_26, %c0_27] : memref<8x8xf32, #tpu.memory_space<vmem>>, vector<8x8xf32>
      tpu.vector_store %arg7[%c0_26, %c0_27], %52 {strides = array<i32>} : memref<8x8xf32, #tpu.memory_space<vmem>>, vector<8x8xf32>,
      %c0_28 = arith.constant 0 : index
      %c0_29 = arith.constant 0 : index
      %54 = vector.load %arg8[%c0_28, %c0_29] : memref<8x8xf32, #tpu.memory_space<vmem>>, vector<8x8xf32>
      %55 = arith.addf %54, %48 : vector<8x8xf32>
      %c0_30 = arith.constant 0 : index
      %c0_31 = arith.constant 0 : index
      %56 = vector.load %arg8[%c0_30, %c0_31] : memref<8x8xf32, #tpu.memory_space<vmem>>, vector<8x8xf32>
      tpu.vector_store %arg8[%c0_30, %c0_31], %55 {strides = array<i32>} : memref<8x8xf32, #tpu.memory_space<vmem>>, vector<8x8xf32>,
      %c0_32 = arith.constant 0 : index
      %c0_33 = arith.constant 0 : index
      %57 = vector.load %arg9[%c0_32, %c0_33] : memref<8x8xf32, #tpu.memory_space<vmem>>, vector<8x8xf32>
      %58 = arith.mulf %48, %7 : vector<8x8xf32>
      %59 = arith.addf %57, %58 : vector<8x8xf32>
      %c0_34 = arith.constant 0 : index
      %c0_35 = arith.constant 0 : index
      %60 = vector.load %arg9[%c0_34, %c0_35] : memref<8x8xf32, #tpu.memory_space<vmem>>, vector<8x8xf32>
      tpu.vector_store %arg9[%c0_34, %c0_35], %59 {strides = array<i32>} : memref<8x8xf32, #tpu.memory_space<vmem>>, vector<8x8xf32>,
    } else {
    }
    %true = arith.constant true
    %27 = arith.xori %24, %true : i1
    %28 = arith.extui %27 : i1 to i32
    %c0_i32_17 = arith.constant 0 : i32
    %29 = arith.cmpi ne, %28, %c0_i32_17 : i32
    scf.if %29 {
      %33 = vector.broadcast %12 : vector<8x1xf32> to vector<8x8xf32>
      %34 = arith.subf %7, %33 : vector<8x8xf32>
      %35 = math.exp %34 : vector<8x8xf32>
      %c0_20 = arith.constant 0 : index
      %c0_21 = arith.constant 0 : index
      %36 = vector.load %arg7[%c0_20, %c0_21] : memref<8x8xf32, #tpu.memory_space<vmem>>, vector<8x8xf32>
      %37 = vector.broadcast %14 : vector<8x1xf32> to vector<8x8xf32>
      %38 = arith.mulf %37, %36 : vector<8x8xf32>
      %39 = arith.addf %38, %35 : vector<8x8xf32>
      %c0_22 = arith.constant 0 : index
      %c0_23 = arith.constant 0 : index
      %40 = vector.load %arg7[%c0_22, %c0_23] : memref<8x8xf32, #tpu.memory_space<vmem>>, vector<8x8xf32>
      tpu.vector_store %arg7[%c0_22, %c0_23], %39 {strides = array<i32>} : memref<8x8xf32, #tpu.memory_space<vmem>>, vector<8x8xf32>,
      %c0_24 = arith.constant 0 : index
      %c0_25 = arith.constant 0 : index
      %41 = vector.load %arg8[%c0_24, %c0_25] : memref<8x8xf32, #tpu.memory_space<vmem>>, vector<8x8xf32>
      %42 = arith.addf %41, %8 : vector<8x8xf32>
      %c0_26 = arith.constant 0 : index
      %c0_27 = arith.constant 0 : index
      %43 = vector.load %arg8[%c0_26, %c0_27] : memref<8x8xf32, #tpu.memory_space<vmem>>, vector<8x8xf32>
      tpu.vector_store %arg8[%c0_26, %c0_27], %42 {strides = array<i32>} : memref<8x8xf32, #tpu.memory_space<vmem>>, vector<8x8xf32>,
      %c0_28 = arith.constant 0 : index
      %c0_29 = arith.constant 0 : index
      %44 = vector.load %arg9[%c0_28, %c0_29] : memref<8x8xf32, #tpu.memory_space<vmem>>, vector<8x8xf32>
      %45 = arith.mulf %8, %7 : vector<8x8xf32>
      %46 = arith.addf %44, %45 : vector<8x8xf32>
      %c0_30 = arith.constant 0 : index
      %c0_31 = arith.constant 0 : index
      %47 = vector.load %arg9[%c0_30, %c0_31] : memref<8x8xf32, #tpu.memory_space<vmem>>, vector<8x8xf32>
      tpu.vector_store %arg9[%c0_30, %c0_31], %46 {strides = array<i32>} : memref<8x8xf32, #tpu.memory_space<vmem>>, vector<8x8xf32>,
    } else {
    }
    %c1_i32_18 = arith.constant 1 : i32
    %30 = arith.cmpi eq, %arg1, %c1_i32_18 : i32
    %31 = arith.extui %30 : i1 to i32
    %c0_i32_19 = arith.constant 0 : i32
    %32 = arith.cmpi ne, %31, %c0_i32_19 : i32
    scf.if %32 {
      %c0_20 = arith.constant 0 : index
      %c0_21 = arith.constant 0 : index
      %33 = vector.load %arg8[%c0_20, %c0_21] : memref<8x8xf32, #tpu.memory_space<vmem>>, vector<8x8xf32>
      %cst_22 = arith.constant dense<0.000000e+00> : vector<8xf32>
      %34 = vector.multi_reduction <add>, %33, %cst_22 [1] : vector<8x8xf32> to vector<8xf32>
      %35 = vector.shape_cast %34 : vector<8xf32> to vector<8x1xf32>
      %c0_23 = arith.constant 0 : index
      %c0_24 = arith.constant 0 : index
      %36 = vector.load %arg9[%c0_23, %c0_24] : memref<8x8xf32, #tpu.memory_space<vmem>>, vector<8x8xf32>
      %cst_25 = arith.constant dense<0.000000e+00> : vector<8xf32>
      %37 = vector.multi_reduction <add>, %36, %cst_25 [1] : vector<8x8xf32> to vector<8xf32>
      %38 = vector.shape_cast %37 : vector<8xf32> to vector<8x1xf32>
      %c0_26 = arith.constant 0 : index
      %c0_27 = arith.constant 0 : index
      %39 = vector.load %arg7[%c0_26, %c0_27] : memref<8x8xf32, #tpu.memory_space<vmem>>, vector<8x8xf32>
      %cst_28 = arith.constant dense<0.000000e+00> : vector<8xf32>
      %40 = vector.multi_reduction <add>, %39, %cst_28 [1] : vector<8x8xf32> to vector<8xf32>
      %41 = vector.shape_cast %40 : vector<8xf32> to vector<8x1xf32>
      %cst_29 = arith.constant 0.000000e+00 : f32
      %42 = vector.broadcast %cst_29 : f32 to vector<8x1xf32>
      %43 = arith.cmpf oeq, %35, %42 : vector<8x1xf32>
      %cst_30 = arith.constant 1.000000e+00 : f32
      %44 = vector.broadcast %cst_30 : f32 to vector<8x1xf32>
      %45 = arith.select %43, %44, %35 : vector<8x1xi1>, vector<8x1xf32>
      %c0_31 = arith.constant 0 : index
      %c0_32 = arith.constant 0 : index
      %46 = vector.load %arg6[%c0_31, %c0_32] : memref<8x1xf32, #tpu.memory_space<vmem>>, vector<8x1xf32>
      %cst_33 = arith.constant 9.99999971E-10 : f32
      %47 = vector.broadcast %cst_33 : f32 to vector<8x1xf32>
      %48 = arith.addf %41, %47 : vector<8x1xf32>
      %49 = math.log %48 : vector<8x1xf32>
      %50 = arith.addf %46, %49 : vector<8x1xf32>
      %51 = arith.mulf %35, %50 : vector<8x1xf32>
      %52 = arith.subf %38, %51 : vector<8x1xf32>
      %53 = arith.divf %52, %45 : vector<8x1xf32>
      %cst_34 = arith.constant 0.000000e+00 : f32
      %54 = vector.broadcast %cst_34 : f32 to vector<8x1xf32>
      %55 = arith.subf %54, %53 : vector<8x1xf32>
      %c0_35 = arith.constant 0 : index
      %c0_36 = arith.constant 0 : index
      %56 = vector.load %arg5[%c0_35, %c0_36] : memref<8x1xf32, #tpu.memory_space<vmem>>, vector<8x1xf32>
      tpu.vector_store %arg5[%c0_35, %c0_36], %55 {strides = array<i32>} : memref<8x1xf32, #tpu.memory_space<vmem>>, vector<8x1xf32>,
    } else {
    }
    return
  }
  func.func @transform_0(%arg0: i32, %arg1: i32) -> (i32, i32) {
    %c0_i32 = arith.constant 0 : i32
    %c0_i32_0 = arith.constant 0 : i32
    return %arg0, %c0_i32 : i32, i32
  }
  func.func @transform_1(%arg0: i32, %arg1: i32) -> (i32, i32) {
    %c0_i32 = arith.constant 0 : i32
    %c0_i32_0 = arith.constant 0 : i32
    return %arg1, %c0_i32 : i32, i32
  }
  func.func @transform_2(%arg0: i32, %arg1: i32) -> (i32, i32) {
    %c0_i32 = arith.constant 0 : i32
    %c0_i32_0 = arith.constant 0 : i32
    %c0_i32_1 = arith.constant 0 : i32
    return %c0_i32, %c0_i32_0 : i32, i32
  }
  func.func @transform_3(%arg0: i32, %arg1: i32) -> (i32, i32) {
    %c0_i32 = arith.constant 0 : i32
    %c0_i32_0 = arith.constant 0 : i32
    return %arg0, %c0_i32 : i32, i32
  }
}

</mosaic_0001>

<bundles_post_ra>
// kernel: unsup_bias_contrastive_loss.3
= control target key start
LH: loop header
LB: loop body
LE: loop exit
PB: predicated region body
PF: predicated region fallthrough
CT: control target
= control target key end

     0   :  { %vm19_vm0 = vcmask 31744   ;;  %v49_v1 = vmov 0   ;;  %v13_v7 = vlaneseq  ;;  %vm37_vm2 = vcmask 7168   ;;  %s77_s0 = inlined_call_operand.vmem [shape: f32[8,4], index: 0, kind: input, shape index: {}]   ;;  %s78_s1 = inlined_call_operand.vmem [shape: s32[8,1], index: 1, kind: input, shape index: {}]   ;;  %s79_s2 = inlined_call_operand.vmem [shape: f32[8,1], index: 2, kind: output, shape index: {}]  }
   0x1   :  { %v11_v0 = vld [vmem:[%s77_s0] sm:$0xff]  ;;  %44 = vset.pattern.permute.xlu0 %v49_v1 }
   0x2   :  { %v20_v2 = vsel %vm19_vm0, %v11_v0, -inf  ;;  %v12_v3 = vld [vmem:[%s78_s1] sm:$0xff]  ;;  %v14_v8 = vand.u32 127, %v13_v7 }
   0x3   :  { %21 = vmax.xlane.f32.xlu0 %v20_v2 }
  0x19   :  { %16 = vperm.xlu0 %44, %v12_v3  }
  0x90   :  { %v22_v4 = vpop.xlane.xlu0 %21 }
  0x91   :  { %v23_v5 = vsub.f32 %v11_v0, %v22_v4 }
  0x93   :  { %v24_v6 = vmul.f32 1.442695, %v23_v5 }
  0x95   :  { %45 = vpow2.f32 %v24_v6 }
  0x98   :  { %v17_v9 = vpop.permute.xlu0 %16 }
  0x99   :  { %vm18_vm1 = vcmp.eq.s32.totalorder %v14_v8, %v17_v9 }
  0x9a   :  { %v32_v11 = vsel %vm18_vm1, %v11_v0, 0.0 }
  0x9b   :  { %v33_v13 = vsel %vm19_vm0, %v32_v11, 0.0 }
  0x9f   :  { %v46_v10 = vpop.eup %45 }
  0xa0   :  { %v26_v12 = vsel %vm19_vm0, %v46_v10, 0.0 }
  0xa1   :  { %27 = vadd.xlane.f32.xlu1 %v26_v12 }
  0xa5   :  { %34 = vadd.xlane.f32.xlu1 %v33_v13 }
 0x12e   :  { %v28_v14 = vpop.xlane.xlu1 %27 }
 0x12f   :  { %47 = vlog2.f32 %v28_v14 }
 0x132   :  { %v35_v17 = vpop.xlane.xlu1 %34 }
 0x139   :  { %v48_v15 = vpop.eup %47 }
 0x13a   :  { %v30_v16 = vmul.f32 0.6931472, %v48_v15 }
 0x13c   :  { %v31_v18 = vadd.f32 %v30_v16, %v22_v4 }
 0x13e   :  { %v36_v19 = vsub.f32 %v31_v18, %v35_v17 }
 0x140   :  { %38 = vst.msk [vmem:[%s79_s2] sm:$0xff] %vm37_vm2, %v36_v19 }

// kernel: unsup_bias_contrastive_loss.4
= control target key start
LH: loop header
LB: loop body
LE: loop exit
PB: predicated region body
PF: predicated region fallthrough
CT: control target
= control target key end

     0   :  { %vm19_vm0 = vcmask 130048   ;;  %v128_v0 = vmov 0.0   ;;  %vm129_vm1 = vmmov 0   ;;  %v130_v4 = vmov 0   ;;  %s171_s1 = inlined_call_operand.vmem [shape: f32[8,16], index: 1, kind: input, shape index: {}, may-alias: {0,1}]   ;;  %s172_s0 = inlined_call_operand.vmem [shape: f32[8,16], index: 0, kind: input, shape index: {}, may-alias: {0,1}]   ;;  %s173_s2 = inlined_call_operand.vmem [shape: s32[8,1], index: 2, kind: input, shape index: {}]   ;;  %s174_s3 = inlined_call_operand.vmem [shape: s32[1,8], index: 3, kind: input, shape index: {}]   ;;  %s175_s4 = inlined_call_operand.vmem [shape: f32[8,8], index: 4, kind: output, shape index: {}]  }
   0x1   :  { %119 = vmatprep.subr.mxu0 %v128_v0  ;;  %v18_v1 = vld [vmem:[%s171_s1] sm:$0xff]  ;;  %121 = vmatprep.mubr.msk.f32.mxu0 %vm129_vm1, %v128_v0  ;;  %vm108_vm3 = vcmask 64512  }
   0x2   :  { %v96_v2 = vld [vmem:[%s173_s2] sm:$0xff]  ;;  %120 = vmatpush3.xpose.msk.msra.mxu0 %vm19_vm0, %v18_v1  ;;  %127 = vset.pattern.permute.xlu0 %v130_v4 }
   0x3   :  { %v17_v3 = vld [vmem:[%s172_s0] sm:$0xff]  ;;  %99 = vperm.xlu0 %127, %v96_v2  }
   0x4   :  { %v116_v5 = vld [vmem:[%s174_s3] ss:$0 sm:$0xff] }
   0x5   :  { %122 = vmatmul.mubr.msk.f32.vlgmr.msra.gmra.mrb[0].mxu0 %vm19_vm0, %v17_v3 }
  0x82   :  { %v100_v6 = vpop.permute.xlu0 %99 }
  0x83   :  { %vm105_vm2 = vcmp.eq.s32.totalorder %v100_v6, %v116_v5 }
  0xd8   :  { %v92_v7 = vpop.f32.mrb[0].mxu0 }
  0xd9   :  { %v106_v8 = vsub.f32 1.0, %v92_v7  ;;  %v123_v9 = vpop.f32.mrb[1].mxu0 }
  0xdb   :  { %v107_v10 = vsel %vm105_vm2, %v106_v8, 0.0 }
  0xdc   :  { %109 = vst.msk [vmem:[%s175_s4] sm:$0xff] %vm108_vm3, %v107_v10 }

// kernel: unsup_bias_contrastive_loss.5
= control target key start
LH: loop header
LB: loop body
LE: loop exit
PB: predicated region body
PF: predicated region fallthrough
CT: control target
= control target key end

     0   :  { %s600_s12 = smov 0   ;;  %s602_s13 = smov 0   ;;  %s720_s0 = inlined_call_operand.vmem [shape: bf16[16,32], index: 0, kind: input, shape index: {}, may-alias: {0,1}]   ;;  %s721_s1 = inlined_call_operand.vmem [shape: bf16[16,32], index: 1, kind: input, shape index: {}, may-alias: {0,1}]   ;;  %s722_s2 = inlined_call_operand.vmem [shape: f32[8,8], index: 2, kind: input, shape index: {}]   ;;  %s723_s3 = inlined_call_operand.vmem [shape: f32[16,1], index: 3, kind: output, shape index: {}]  }
   0x1   :  { %s604_s14 = smov 0   ;;  %s606_s15 = smov 0  }
   0x2   :  { %s608_s16 = smov 0  }
   0x3 LB: > { %s22_s17 = sadd.s32 1, %s564_s14  ;;  %s25_s18 = sadd.s32 1, %s568_s15  ;;  %s572_s16 = sphi %s608_s16, %s13_s16   ;;  %s568_s15 = sphi %s606_s15, %s729_s15   ;;  %s564_s14 = sphi %s604_s14, %s728_s14   ;;  %s560_s13 = sphi %s602_s13, %s727_s13   ;;  %s556_s12 = sphi %s600_s12, %s726_s12  }
   0x4   : > { %p23_p0 = scmp.ge.s32.totalorder %s22_s17, 2  ;;  %p451_p1 = scmp.ge.s32.totalorder %s572_s16, 1 }
   0x5   : > { %p157_p2 = scmp.lt.s32.totalorder %s572_s16, 5 }
   0x6   : > { %s731_s17 = smov (%p23_p0, %s22_s17), 0  ;;  %s733_s18 = smov (!%p23_p0, %s25_s18), %s568_s15 }
   0x7   : > { %p158_p3 = pnand %p451_p1, %p157_p2  ;;  %p27_p4 = scmp.ge.s32.totalorder %s733_s18, 2 }
   0x8   : > { %p183_p5 = scmp.lt.s32.totalorder (!%p158_p3), %s560_s13, 1  ;;  %p187_p6 = scmp.lt.s32.totalorder (!%p158_p3), %s556_s12, 1 }
   0x9   : > { %s735_s18 = smov (%p27_p4, %s733_s18), 0  ;;  %161 = sbr.rel (%p158_p3) target bundleno = 868 (0x364), region = 32 }
   0xa   : > { %p455_p7 = scmp.ne.s32.totalorder (!%p158_p3), %s556_s12, 0 }
  0x10   : > { %s184_s19 = scalar_select %p183_p5, %s560_s13, 1 }
  0x11   : > { %s188_s20 = scalar_select %p187_p6, %s556_s12, 1 }
  0x12   : > { %s452_s21 = sshll.u32 %s184_s19, 2  ;;  %s454_s22 = sshll.u32 %s184_s19, 3  ;;  %vm200_vm0 = vcmask (!%p455_p7), 7168   ;;  %vm202_vm1 = vcmask (!%p455_p7), 64512   ;;  %v574_v0 = vmov (!%p455_p7), -inf   ;;  %v575_v1 = vmov (!%p455_p7), 0.0  }
  0x13   : > { %s186_s25 = scalar_lea.vmem %s720_s0, %s452_s21  ;;  %s453_s26 = sshll.u32 %s188_s20, 2  ;;  %201 = vst.msk [vmem:[#allocation2] sm:$0xff] (!%p455_p7), %vm200_vm0, %v574_v0 }
  0x14   : > { %s190_s29 = scalar_lea.vmem %s721_s1, %s453_s26  ;;  %s647_s5 = scalar_lea.vmem %s723_s3, %s454_s22  ;;  %203 = vst.msk [vmem:[#allocation3] sm:$0xff] (!%p455_p7), %vm202_vm1, %v575_v1  ;;  %204 = vst.msk [vmem:[#allocation4] sm:$0xff] (!%p455_p7), %vm202_vm1, %v575_v1 }
  0x15   : > { %199 = sbr.rel (%p455_p7) target bundleno = 28 (0x1c), region = 36  ;;  %205 = vst.msk [vmem:[#allocation5] sm:$0xff] (!%p455_p7), %vm202_vm1, %v575_v1 }
  0x1c PF: > { %v207_v2 = vld [vmem:[%s190_s29] sm:$0xf]  ;;  %vm208_vm2 = vcmask 261120   ;;  %v576_v3 = vmov 0.0   ;;  %vm577_vm3 = vmmov 0   ;;  %vm258_vm4 = vcmask 64512  }
  0x1d   : > { %470 = vmatprep.subr.bf16.mxu0 %v576_v3  ;;  %v213_v4 = vsel %vm208_vm2, %v207_v2, 0  ;;  %472 = vmatprep.mubr.msk.bf16.mxu0 %vm577_vm3, %v576_v3  ;;  %v206_v5 = vld [vmem:[%s186_s25] sm:$0xf]  ;;  %s457_s8 = sshll.u32 %s560_s13, 3  ;;  %s464_s9 = sshll.u32 %s556_s12, 3  ;;  %vm266_vm5 = vcmask 7168  }
  0x1e   : > { %471 = vmatpush3.bf16.xpose.msra.mxu0 %v213_v4  ;;  %v653_v6 = vld [vmem:[%s722_s2] sm:$0xff]  ;;  %s465_s10 = sadd.s32 8, %s464_s9  ;;  %s467_s11 = sadd.s32 8, %s457_s8 }
  0x1f   : > { %p661_p8 = scmp.lt.s32.totalorder %s457_s8, %s465_s10  ;;  %p665_p9 = scmp.lt.s32.totalorder %s464_s9, %s467_s11  ;;  %v257_v13 = vld [vmem:[#allocation2] sm:$0xff] }
  0x21   : > { %p276_p10 = pnand %p665_p9, %p661_p8 }
  0x22   : > { %v578_v19 = vmov (!%p276_p10), 0   ;;  %v280_v20 = vlaneseq (!%p276_p10)  ;;  %v282_v21 = vstv (!%p276_p10), %s457_s8  ;;  %v286_v22 = vstv (!%p276_p10), %s464_s9  ;;  %v308_v27 = vld [vmem:[#allocation4] sm:$0xff] (!%p276_p10)  ;;  %v311_v28 = vld [vmem:[#allocation5] sm:$0xff] (!%p276_p10)  ;;  %v299_v36 = vld [vmem:[#allocation3] sm:$0xff] (!%p276_p10) }
  0x23   : > { %524 = vset.pattern.permute.xlu0 (!%p276_p10), %v578_v19 }
  0x24   : > { %v281_v23 = vshrl.u32 (!%p276_p10), %v280_v20, 7  ;;  %v285_v24 = vand.u32 (!%p276_p10), 127, %v280_v20 }
  0x25   : > { %473 = vmatmul.mubr.msk.bf16.vlgmr.msra.gmra.mrb[0].mxu0 %vm208_vm2, %v206_v5 }
  0x26   : > { %v283_v25 = vadd.s32 (!%p276_p10), %v282_v21, %v281_v23  ;;  %v287_v26 = vadd.s32 (!%p276_p10), %v286_v22, %v285_v24 }
  0x28   : > { %vm288_vm6 = vcmp.ne.s32.totalorder (!%p276_p10), %v283_v25, %v287_v26 }
  0x29   : > { %v298_v29 = vsel (!%p276_p10), %vm288_vm6, %v653_v6, 0.0 }
  0x2a   : > { %v309_v31 = vadd.f32 (!%p276_p10), %v308_v27, %v298_v29 }
  0x2c   : > { %310 = vst.msk [vmem:[#allocation4] sm:$0xff] (!%p276_p10), %vm258_vm4, %v309_v31 }
  0xf8   : > { %v249_v7 = vpop.f32.mrb[0].mxu0 }
  0xf9   : > { %v655_v8 = vmul.f32 14.285714, %v249_v7  ;;  %v474_v9 = vpop.f32.mrb[1].mxu0 }
  0xfa   : > { %v252_v10 = vpop.f32.mrb[2].mxu0 }
  0xfb   : > { %v475_v11 = vpop.f32.mrb[3].mxu0  ;;  %v259_v12 = vsel %vm258_vm4, %v655_v8, -inf  ;;  %v312_v30 = vmul.f32 (!%p276_p10), %v298_v29, %v655_v8 }
  0xfc   : > { %260 = vmax.xlane.f32.xlu0 %v259_v12 }
  0xfd   : > { %v313_v32 = vadd.f32 (!%p276_p10), %v312_v30, %v311_v28 }
  0xff   : > { %314 = vst.msk [vmem:[#allocation5] sm:$0xff] (!%p276_p10), %vm258_vm4, %v313_v32 }
 0x189   : > { %v261_v14 = vpop.xlane.xlu0 %260 }
 0x18a   : > { %v262_v15 = vmax.f32 %v257_v13, %v261_v14 }
 0x18c   : > { %v263_v16 = vsub.f32 %v257_v13, %v262_v15  ;;  %267 = vst.msk [vmem:[#allocation2] sm:$0xff] %vm266_vm5, %v262_v15  ;;  %291 = vperm.xlu0 (!%p276_p10), %524, %v262_v15  }
 0x18e   : > { %v264_v17 = vmul.f32 1.442695, %v263_v16 }
 0x190   : > { %522 = vpow2.f32 %v264_v17 }
 0x194   : > { %279 = sbr.rel (%p276_p10) target bundleno = 544 (0x220), region = 40 }
 0x19a   : > { %v523_v18 = vpop.eup %522 }
 0x19b   : > { %302 = vperm.xlu0 %524, %v523_v18  }
 0x20b   : > { %v292_v33 = vpop.permute.xlu0 %291 }
 0x20c   : > { %v294_v34 = vsub.f32 %v655_v8, %v292_v33 }
 0x20e   : > { %v295_v35 = vmul.f32 1.442695, %v294_v34 }
 0x210   : > { %525 = vpow2.f32 %v295_v35 }
 0x21a   : > { %v303_v37 = vpop.permute.xlu0 %302  ;;  %v526_v38 = vpop.eup %525 }
 0x21b   : > { %v305_v39 = vmul.f32 %v303_v37, %v299_v36  ;;  %v297_v40 = vsel %vm288_vm6, %v526_v38, 0.0 }
 0x21d   : > { %v306_v41 = vadd.f32 %v305_v39, %v297_v40 }
 0x21f   : > { %307 = vst.msk [vmem:[#allocation3] sm:$0xff] %vm258_vm4, %v306_v41 }
 0x220 PF: > { %317 = sbr.rel (!%p276_p10) target bundleno = 692 (0x2b4), region = 44  ;;  %v579_v42 = vmov (%p276_p10), 0   ;;  %v339_v43 = vmul.f32 (%p276_p10), %v653_v6, %v655_v8  ;;  %v335_v44 = vld [vmem:[#allocation4] sm:$0xff] (%p276_p10)  ;;  %v338_v45 = vld [vmem:[#allocation5] sm:$0xff] (%p276_p10) }
 0x221   : > { %527 = vset.pattern.permute.xlu0 (%p276_p10), %v579_v42  ;;  %v336_v46 = vadd.f32 (%p276_p10), %v335_v44, %v653_v6 }
 0x222   : > { %320 = vperm.xlu0 (%p276_p10), %527, %v262_v15   ;;  %v340_v47 = vadd.f32 (%p276_p10), %v339_v43, %v338_v45 }
 0x223   : > { %337 = vst.msk [vmem:[#allocation4] sm:$0xff] (%p276_p10), %vm258_vm4, %v336_v46 }
 0x224   : > { %341 = vst.msk [vmem:[#allocation5] sm:$0xff] (%p276_p10), %vm258_vm4, %v340_v47 }
 0x226   : > { %329 = vperm.xlu0 (%p276_p10), %527, %v523_v18   ;;  %v326_v51 = vld [vmem:[#allocation3] sm:$0xff] (%p276_p10) }
 0x2a1   : > { %v321_v48 = vpop.permute.xlu0 %320 }
 0x2a2   : > { %v323_v49 = vsub.f32 %v655_v8, %v321_v48 }
 0x2a4   : > { %v324_v50 = vmul.f32 1.442695, %v323_v49 }
 0x2a5   : > { %v330_v52 = vpop.permute.xlu0 %329 }
 0x2a6   : > { %528 = vpow2.f32 %v324_v50  ;;  %v332_v53 = vmul.f32 %v330_v52, %v326_v51 }
 0x2b0   : > { %v529_v54 = vpop.eup %528 }
 0x2b1   : > { %v333_v55 = vadd.f32 %v529_v54, %v332_v53 }
 0x2b3   : > { %334 = vst.msk [vmem:[#allocation3] sm:$0xff] %vm258_vm4, %v333_v55 }
 0x2b4 PF: > { %p461_p11 = scmp.ne.s32.totalorder %s556_s12, 1 }
 0x2b5   : > { %v360_v3 = vld [vmem:[#allocation2] sm:$0xff] (!%p461_p11) }
 0x2b6   : > { %345 = sbr.rel (%p461_p11) target bundleno = 868 (0x364), region = 48 }
 0x2b7   : > { %v346_v57 = vld [vmem:[#allocation4] sm:$0xff] (!%p461_p11) }
 0x2b8   : > { %v350_v58 = vld [vmem:[#allocation5] sm:$0xff] (!%p461_p11)  ;;  %v347_v61 = vsel (!%p461_p11), %vm258_vm4, %v346_v57, 0.0 }
 0x2b9   : > { %v351_v60 = vsel (!%p461_p11), %vm258_vm4, %v350_v58, 0.0 }
 0x2ba   : > { %v354_v56 = vld [vmem:[#allocation3] sm:$0xff] (!%p461_p11)  ;;  %352 = vadd.xlane.f32.xlu1 (!%p461_p11), %v351_v60 }
 0x2bb   : > { %v355_v59 = vsel (!%p461_p11), %vm258_vm4, %v354_v56, 0.0 }
 0x2bc   : > { %356 = vadd.xlane.f32.xlu0 (!%p461_p11), %v355_v59 }
 0x2c0   : > { %348 = vadd.xlane.f32.xlu0 %v347_v61 }
 0x347   : > { %v353_v6 = vpop.xlane.xlu1 %352 }
 0x349   : > { %v357_v62 = vpop.xlane.xlu0 %356 }
 0x34a   : > { %v361_v63 = vadd.f32 1e-09, %v357_v62 }
 0x34c   : > { %530 = vlog2.f32 %v361_v63 }
 0x34d   : > { %v349_v0 = vpop.xlane.xlu0 %348 }
 0x34e   : > { %vm358_vm7 = vcmp.eq.f32.partialorder %v349_v0, 0.0 }
 0x34f   : > { %v359_v1 = vsel %vm358_vm7, 1.0, %v349_v0 }
 0x350   : > { %532 = vrcp.f32 %v359_v1 }
 0x356   : > { %v531_v2 = vpop.eup %530 }
 0x357   : > { %v363_v4 = vmul.f32 0.6931472, %v531_v2 }
 0x359   : > { %v364_v5 = vadd.f32 %v363_v4, %v360_v3 }
 0x35a   : > { %v533_v8 = vpop.eup %532 }
 0x35b   : > { %v365_v7 = vmul.f32 %v364_v5, %v349_v0 }
 0x35d   : > { %v366_v9 = vsub.f32 %v353_v6, %v365_v7 }
 0x35f   : > { %v368_v10 = vmul.f32 %v533_v8, %v366_v9 }
 0x361   : > { %v369_v11 = vsub.f32 0.0, %v368_v10 }
 0x363   : > { %370 = vst.msk [vmem:[%s647_s5] sm:$0xff] %vm266_vm5, %v369_v11 }
 0x364 PF: > { %s13_s16 = sadd.s32 1, %s572_s16   ;;  %s726_s12 = smov %s564_s14 }
 0x365   : > { %p10_p12 = scmp.ge.s32.totalorder %s13_s16, 6   ;;  %s727_s13 = smov %s568_s15 }
 0x366   : > { %s728_s14 = smov %s731_s17  ;;  %s729_s15 = smov %s735_s18 }
 0x367   :  { %12 = sbr.rel (!%p10_p12) target bundleno = 3 (0x3), region = 81 }

</bundles_post_ra>
